<compile_context>
chip_gen: v7x
topology: tpu7x:2x2x1
jax: 0.10.0
libtpu: 0.0.40
codegen_flags: <defaults>
</compile_context>

<pallas_src>
import functools

import jax
import jax.numpy as jnp
from jax.experimental import pallas as pl
from jax.experimental.pallas import tpu as pltpu


def _bilinear_kernel(x_ref, w_ref, zt_ref, o_ref, *, apply_sigmoid):
    # Fold: M = W @ Zs.T  -> (dobs, n_pad). Tiny (dobs*daction*n_pad flops),
    # recomputed per batch tile while the weight tiles stay VMEM-resident.
    m = jnp.dot(
        w_ref[...], zt_ref[...], preferred_element_type=jnp.float32
    ).astype(x_ref.dtype)  # keep the big GEMM on the native (e.g. bf16) MXU path

    # Single GEMM: out = Xs @ M  -> (bm, n_pad), f32 accumulation on the MXU.
    out = jnp.dot(x_ref[...], m, preferred_element_type=jnp.float32)

    if apply_sigmoid:
        # EUP transcendental; its VLIW slot is free under an MXU-bound kernel.
        out = jax.nn.sigmoid(out)

    o_ref[...] = out.astype(o_ref.dtype)


def _bilinear_call(Xs, W, Zs, *, apply_sigmoid, compute_dtype, bm):
    B, dobs = Xs.shape
    dobs_w, daction = W.shape
    naction, daction_z = Zs.shape
    assert dobs == dobs_w and daction == daction_z

    if compute_dtype is not None:
        Xs = Xs.astype(compute_dtype)
        W = W.astype(compute_dtype)
        Zs = Zs.astype(compute_dtype)
    out_dtype = Xs.dtype

    # Wrapper-side layout plumbing: transpose Zs and pad the output/lane dim to a
    # multiple of 128 so the in-kernel store is lane-dense (unmasked vst).
    n_pad = ((naction + 127) // 128) * 128
    ZsT = Zs.T  # (daction, naction)
    if n_pad != naction:
        ZsT = jnp.pad(ZsT, ((0, 0), (0, n_pad - naction)))

    # Batch tile: 256 rows matches the v6e/v7x MXU height; footprint per tile is
    # ~2*(bm*dobs*4) + weights + 2*(bm*n_pad*4) bytes — far under 64 MiB VMEM (v7x).
    if bm is None:
        bm = min(B, 256)
    grid = (pl.cdiv(B, bm),)

    itemsize = jnp.dtype(out_dtype).itemsize
    flops = 2 * B * dobs * n_pad + 2 * grid[0] * dobs * daction * n_pad
    bytes_accessed = (
        Xs.size * itemsize
        + W.size * itemsize
        + ZsT.size * itemsize
        + B * n_pad * itemsize
    )
    transcendentals = B * n_pad if apply_sigmoid else 0

    kernel = functools.partial(_bilinear_kernel, apply_sigmoid=apply_sigmoid)

    out_full = pl.pallas_call(
        kernel,
        out_shape=jax.ShapeDtypeStruct((B, n_pad), out_dtype),
        grid=grid,
        in_specs=[
            # Xs: streamed over the batch grid (double-buffered by Pallas).
            pl.BlockSpec((bm, dobs), lambda i: (i, 0)),
            # W and Zs.T: same block for every grid step -> stay VMEM-resident.
            pl.BlockSpec((dobs, daction), lambda i: (0, 0)),
            pl.BlockSpec((daction, n_pad), lambda i: (0, 0)),
        ],
        out_specs=pl.BlockSpec((bm, n_pad), lambda i: (i, 0)),
        compiler_params=pltpu.CompilerParams(
            dimension_semantics=("parallel",)
        ),
        cost_estimate=pl.CostEstimate(
            flops=flops,
            transcendentals=transcendentals,
            bytes_accessed=bytes_accessed,
        ),
    )(Xs, W, ZsT)

    if n_pad != naction:
        out_full = out_full[:, :naction]
    return out_full


def bilinear_forward(Xs, W, Zs, *, compute_dtype=None, bm=None):
    """forward(Xs, Zs) = (Xs @ W) @ Zs.T, fused into one Pallas GEMM."""
    return _bilinear_call(Xs, W, Zs, apply_sigmoid=False,
                          compute_dtype=compute_dtype, bm=bm)


def bilinear_preq1(Xs, W, Zs, *, compute_dtype=None, bm=None):
    """sigmoid(forward(Xs, Zs)) with the sigmoid fused into the same kernel."""
    return _bilinear_call(Xs, W, Zs, apply_sigmoid=True,
                          compute_dtype=compute_dtype, bm=bm)


def preq1(logits):
    # Standalone sigmoid for already-materialized logits (matches module.preq1).
    return jax.nn.sigmoid(logits)


if __name__ == "__main__":
    # Small shapes consistent with the module: batch=8, dobs=32, daction=16, naction=8
    B, dobs, daction, naction = 8, 32, 16, 8

    key = jax.random.PRNGKey(0)
    kx, kz, kw = jax.random.split(key, 3)
    Xs = jax.random.normal(kx, (B, dobs), dtype=jnp.float32)
    Zs = jax.random.normal(kz, (naction, daction), dtype=jnp.float32)
    # nn.Parameter(torch.zeros(...)) is deterministic; use small random values so
    # the correctness check is non-trivial.
    W = 0.02 * jax.random.normal(kw, (dobs, daction), dtype=jnp.float32)

    ref = (Xs @ W) @ Zs.T

    # forward (logits)
    logits = bilinear_forward(Xs, W, Zs)
    jax.block_until_ready(logits)
    assert logits.shape == (B, naction)
    assert jnp.allclose(logits, ref, atol=1e-5, rtol=1e-5)

    # preq1 fused in-kernel (sigmoid on the EUP)
    probs = bilinear_preq1(Xs, W, Zs)
    jax.block_until_ready(probs)
    assert probs.shape == (B, naction)
    assert jnp.allclose(probs, jax.nn.sigmoid(ref), atol=1e-5, rtol=1e-5)

    # Optional bf16 operand path (f32 accumulation kept); loose tolerance.
    logits_bf16 = bilinear_forward(Xs, W, Zs, compute_dtype=jnp.bfloat16)
    jax.block_until_ready(logits_bf16)
    assert jnp.allclose(logits_bf16.astype(jnp.float32), ref, atol=5e-2, rtol=5e-2)

    print("KERNEL_OK")
</pallas_src>

<mosaic_0001>
module attributes {stable_mosaic.version = 11 : i64} {
  func.func @_bilinear_kernel(%arg0: i32, %arg1: memref<8x32xf32, #tpu.memory_space<vmem>>, %arg2: memref<32x16xf32, #tpu.memory_space<vmem>>, %arg3: memref<16x128xf32, #tpu.memory_space<vmem>>, %arg4: memref<8x128xf32, #tpu.memory_space<vmem>>) attributes {dimension_semantics = [#tpu.dimension_semantics<parallel>], iteration_bounds = array<i64: 1>, scalar_prefetch = 0 : i64, scratch_operands = 0 : i64, tpu.core_type = #tpu.core_type<tc>, window_params = [{transform_indices = @transform_0, window_bounds = array<i64: 8, 32>}, {pipeline_mode = #tpu.pipeline_mode<synchronous>, transform_indices = @transform_1, window_bounds = array<i64: 32, 16>}, {pipeline_mode = #tpu.pipeline_mode<synchronous>, transform_indices = @transform_2, window_bounds = array<i64: 16, 128>}, {transform_indices = @transform_3, window_bounds = array<i64: 8, 128>}]} {
    %c0 = arith.constant 0 : index
    %c0_0 = arith.constant 0 : index
    %0 = vector.load %arg2[%c0, %c0_0] : memref<32x16xf32, #tpu.memory_space<vmem>>, vector<32x16xf32>
    %c0_1 = arith.constant 0 : index
    %c0_2 = arith.constant 0 : index
    %1 = vector.load %arg3[%c0_1, %c0_2] : memref<16x128xf32, #tpu.memory_space<vmem>>, vector<16x128xf32>
    %cst = arith.constant dense<0.000000e+00> : vector<32x128xf32>
    %2 = tpu.matmul %0, %1, %cst {dimension_numbers = #tpu.dot_dimension_numbers<[1], [0], [0], [1], [0, 0, 1, 1], [], []>} : vector<32x16xf32>, vector<16x128xf32>, vector<32x128xf32> -> vector<32x128xf32>
    %c0_3 = arith.constant 0 : index
    %c0_4 = arith.constant 0 : index
    %3 = vector.load %arg1[%c0_3, %c0_4] : memref<8x32xf32, #tpu.memory_space<vmem>>, vector<8x32xf32>
    %cst_5 = arith.constant dense<0.000000e+00> : vector<8x128xf32>
    %4 = tpu.matmul %3, %2, %cst_5 {dimension_numbers = #tpu.dot_dimension_numbers<[1], [0], [0], [1], [0, 0, 1, 1], [], []>} : vector<8x32xf32>, vector<32x128xf32>, vector<8x128xf32> -> vector<8x128xf32>
    %c0_6 = arith.constant 0 : index
    %c0_7 = arith.constant 0 : index
    %5 = vector.load %arg4[%c0_6, %c0_7] : memref<8x128xf32, #tpu.memory_space<vmem>>, vector<8x128xf32>
    tpu.vector_store %arg4[%c0_6, %c0_7], %4 {strides = array<i32>} : memref<8x128xf32, #tpu.memory_space<vmem>>, vector<8x128xf32>,
    return
  }
  func.func @transform_0(%arg0: i32) -> (i32, i32) {
    %c0_i32 = arith.constant 0 : i32
    %c0_i32_0 = arith.constant 0 : i32
    return %arg0, %c0_i32 : i32, i32
  }
  func.func @transform_1(%arg0: i32) -> (i32, i32) {
    %c0_i32 = arith.constant 0 : i32
    %c0_i32_0 = arith.constant 0 : i32
    %c0_i32_1 = arith.constant 0 : i32
    return %c0_i32, %c0_i32_0 : i32, i32
  }
  func.func @transform_2(%arg0: i32) -> (i32, i32) {
    %c0_i32 = arith.constant 0 : i32
    %c0_i32_0 = arith.constant 0 : i32
    %c0_i32_1 = arith.constant 0 : i32
    return %c0_i32, %c0_i32_0 : i32, i32
  }
  func.func @transform_3(%arg0: i32) -> (i32, i32) {
    %c0_i32 = arith.constant 0 : i32
    %c0_i32_0 = arith.constant 0 : i32
    return %arg0, %c0_i32 : i32, i32
  }
}

</mosaic_0001>

<bundles_post_ra>
// kernel: tpu_custom_call.1
= control target key start
LH: loop header
LB: loop body
LE: loop exit
PB: predicated region body
PF: predicated region fallthrough
CT: control target
= control target key end

     0   :  { %vm21_vm0 = vcmask 130048   ;;  %s341_s0 = inlined_call_operand.vmem [shape: f32[8,32], index: 0, kind: input, shape index: {}]   ;;  %s342_s1 = inlined_call_operand.vmem [shape: f32[32,16], index: 1, kind: input, shape index: {}]   ;;  %s343_s2 = inlined_call_operand.vmem [shape: f32[16,128], index: 2, kind: input, shape index: {}]   ;;  %s344_s3 = inlined_call_operand.hbm [shape: f32[8,128], index: 3, kind: output, shape index: {}]  }
   0x1   :  { %v19_v0 = vld [vmem:[%s343_s2] sm:$0xff]  ;;  %v20_v1 = vld [vmem:[%s343_s2 + $0x8] sm:$0xff] }
   0x2   :  { %v15_v2 = vld [vmem:[%s342_s1] sm:$0xff]  ;;  %v246_v3 = vpack.c.bf16 %v20_v1, %v19_v0 }
   0x3   :  { %229 = vmatprep.mubr.msk.f32.mxu0 %vm21_vm0, %v15_v2 }
   0x4   :  { %8 = vsyncpa [#allocation3], 0  ;;  %247 = vmatprep.subr.bf16.mxu0 %v246_v3  ;;  %v16_v4 = vld [vmem:[%s342_s1 + $0x8] sm:$0xff]  ;;  %v17_v5 = vld [vmem:[%s342_s1 + $0x10] sm:$0xff]  ;;  %v284_v7 = vmov 0.0|0.0   ;;  %vm285_vm1 = vmmov 0  }
   0x5   :  { %249 = vmatpush3.bf16.msra.mxu0 %v246_v3  ;;  %v18_v6 = vld [vmem:[%s342_s1 + $0x18] sm:$0xff]  ;;  %250 = vmatprep.subr.bf16.mxu1 %v284_v7  ;;  %v286_v8 = vmov 0.0   ;;  %v119_v15 = vld [vmem:[%s341_s0] sm:$0xff]  ;;  %vm120_vm2 = vcmask 261120   ;;  %s287_s1 = smov [#allocation2]  }
   0x6   :  { %243 = vmatprep.mubr.msk.f32.mxu1 %vm285_vm1, %v286_v8  ;;  %s201_s25 = sshll.u32 %s287_s1, 4  ;;  %s202_s25 = int_to_ptr.vmem [resolvable:$true] %s201_s25 }
   0x7   :  { %s260_s26 = scalar_lea.vmem %s202_s25, 128  ;;  %p265_p1 = scmp.lt.s32.totalorder %s202_s25, %s202_s25 }
   0x8   :  { %230 = vmatmul.mubr.msk.f32.vlgmr.msra.gmra.mrb[0].mxu0 %vm21_vm0, %v16_v4  ;;  %p261_p0 = scmp.ne.s32.totalorder %s202_s25, %s260_s26  ;;  %p266_p2 = scmp.lt.s32.totalorder %s260_s26, %s260_s26 }
   0x9   :  { %232 = vmatprep.mubr.msk.f32.mxu0 %vm21_vm0, %v17_v5 }
   0xa   :  { %p267_p3 = por %p266_p2, %p265_p1 }
   0xc   :  { %233 = vmatmul.mubr.msk.f32.gmra.mrb[2].mxu0 %vm21_vm0, %v18_v6  ;;  %p268_p4 = pnand %p267_p3, %p261_p0 }
  0xdb   :  { %v231_v9 = vpop.f32.mrb[0].mxu0 }
  0xdc   :  { %v100_v10 = vpop.f32.mrb[1].mxu0 }
  0xdd   :  { %v251_v11 = vpack.c.bf16 %v231_v9, %v100_v10 }
  0xdf   :  { %v234_v12 = vpop.f32.mrb[2].mxu0  ;;  %252 = vmatpush3.bf16.msra.mxu1 %v251_v11 }
  0xe0   :  { %v110_v13 = vpop.f32.mrb[3].mxu0  ;;  %253 = vmatprep.subr.bf16.mxu1 %v284_v7 }
  0xe1   :  { %v254_v14 = vpack.c.bf16 %v234_v12, %v110_v13 }
  0xe3   :  { %255 = vmatpush3.bf16.msra.mxu1 %v254_v14 }
  0xe6   :  { %244 = vmatmul.mubr.msk.f32.vlgmr.msra.gmra.mrb[0].mxu1 %vm120_vm2, %v119_v15 }
 0x1b9   :  { %v190_v16 = vpop.f32.mrb[0].mxu1 }
 0x1ba   :  { %194 = vst [vmem:[#allocation2] sm:$0xff] %v190_v16  ;;  %v245_v17 = vpop.f32.mrb[1].mxu1 }
 0x1bb   :  { %271 = shalt.err (!%p268_p4)
}
 0x1bc   :  { %s272_s29 = scalar_lea.hbm %s344_s3, 128 }
 0x1bd   :  { %p273_p5 = scmp.ne.s32.totalorder %s344_s3, %s272_s29  ;;  %p276_p6 = scmp.lt.u32.totalorder %s272_s29, %s344_s3 }
 0x1bf   :  { %p278_p7 = pnand %p276_p6, %p273_p5 }
 0x1c1   :  { %281 = shalt.err (!%p278_p7)
}
 0x1c2   :  { %204 = dma.vmem_to_hbm [thread:$0]  %s202_s25, 128, %s344_s3, [#allocation3]  }
 0x1c3   :  { %282 = dma.done.wait [#allocation3], 128  }
 0x1c4   :  { %283 = vsyncadd [#allocation3], 4294967168 }
 0x1c5   :  { %208 = vsyncpa [#allocation3], 1 }

</bundles_post_ra>
